<compile_context>
chip_gen: v7x
topology: tpu7x:2x2x1
jax: 0.10.0
libtpu: 0.0.40
codegen_flags: <defaults>
</compile_context>

<pallas_src>
import functools

import jax
import jax.numpy as jnp
from jax.experimental import pallas as pl
from jax.experimental.pallas import tpu as pltpu

DELTA = 2.0
LANE = 128
MAX_BLOCK_ROWS = 2048      # (2048, 128) f32 = 1 MiB per input per buffer
MAX_GROUP_ROWS = 64        # inner-loop chunk: 8 f32 vregs per temporary


def _huber_and_mask(yhat_ref, y_ref, r0, group_rows):
    yhat = yhat_ref[pl.ds(r0, group_rows), :].astype(jnp.float32)
    y = y_ref[pl.ds(r0, group_rows), :].astype(jnp.float32)
    diff = yhat - y
    absd = jnp.abs(diff)
    q = jnp.minimum(absd, DELTA)          # branchless Huber, delta = 2.0
    huber = q * (absd - 0.5 * q)
    mask_f = (y > -999.0).astype(jnp.float32)
    return huber, mask_f


def _fold(x):
    # (group_rows, 128) -> (8, 128): vreg-aligned reshape + pure-VPU adds.
    return x.reshape(-1, 8, LANE).sum(axis=0)


def _mask_loss_kernel(yhat_ref, y_ref, loss_acc_ref, cnt_acc_ref, *,
                      rows_valid, blocks_per_shard, total_blocks,
                      group_rows, needs_tail_mask):
    s = pl.program_id(0)          # shard (parallel; one per TensorCore on v7x)
    i = pl.program_id(1)          # block within shard (reduction axis)
    block_rows = yhat_ref.shape[0]
    num_groups = block_rows // group_rows
    unroll = min(8, num_groups)

    @pl.when(i == 0)
    def _init():
        loss_acc_ref[...] = jnp.zeros_like(loss_acc_ref)
        cnt_acc_ref[...] = jnp.zeros_like(cnt_acc_ref)

    def run(body):
        zero = jnp.zeros((8, LANE), jnp.float32)
        loss_p, cnt_p = jax.lax.fori_loop(0, num_groups, body, (zero, zero),
                                          unroll=unroll)
        loss_acc_ref[...] = loss_acc_ref[...] + loss_p[None]
        cnt_acc_ref[...] = cnt_acc_ref[...] + cnt_p[None]

    def fast_body(g, carry):
        loss_p, cnt_p = carry
        r0 = pl.multiple_of(g * group_rows, group_rows)
        huber, mask_f = _huber_and_mask(yhat_ref, y_ref, r0, group_rows)
        # multiply-by-mask == PyTorch `elem_loss * mask` (NaN propagates).
        return loss_p + _fold(huber * mask_f), cnt_p + _fold(mask_f)

    if not needs_tail_mask:
        run(fast_body)
    else:
        blk = s * blocks_per_shard + i          # logical (unclamped) block id
        is_tail = blk >= total_blocks - 1

        @pl.when(jnp.logical_not(is_tail))
        def _fast():
            run(fast_body)

        @pl.when(is_tail)
        def _tail():
            # Ragged / clamped-duplicate block: rows past the logical end of
            # the array are discarded with jnp.where so OOB garbage (incl.
            # NaN/Inf) cannot leak into the sums and clamped re-reads are not
            # double counted.
            def tail_body(g, carry):
                loss_p, cnt_p = carry
                r0 = pl.multiple_of(g * group_rows, group_rows)
                huber, mask_f = _huber_and_mask(yhat_ref, y_ref, r0, group_rows)
                row_ids = (blk * block_rows + r0
                           + jax.lax.broadcasted_iota(
                               jnp.int32, (group_rows, LANE), 0))
                in_bounds = row_ids < rows_valid
                loss_p = loss_p + _fold(
                    jnp.where(in_bounds, huber * mask_f, 0.0))
                cnt_p = cnt_p + _fold(jnp.where(in_bounds, mask_f, 0.0))
                return loss_p, cnt_p

            run(tail_body)


def _packing(dtype):
    # sub-32-bit dtypes pack along sublanes: 1 for f32, 2 for bf16/f16, ...
    return max(1, 4 // jnp.dtype(dtype).itemsize)


def _pick_group_rows(block_rows, sub):
    """Largest divisor of block_rows that is a multiple of sub and <= 64."""
    best = sub
    g = sub
    limit = min(MAX_GROUP_ROWS, block_rows)
    while g <= limit:
        if block_rows % g == 0:
            best = g
        g += sub
    return best


def _num_shards_for_device(total_blocks):
    # Only v7x has two TensorCores per chip; on 1-TC chips the extra shard
    # axis just risks one duplicated clamped-block DMA when total_blocks is
    # odd, so drop it there.
    if total_blocks < 2:
        return 1
    try:
        kind = jax.devices()[0].device_kind.lower()
    except Exception:  # pragma: no cover
        return 1
    return 2 if ("v7" in kind or "7x" in kind) else 1


def mask_loss(yhat, y):
    """Masked Huber loss (delta=2.0). yhat, y: arrays of identical shape."""
    assert yhat.shape == y.shape
    n = yhat.size
    # Kernel row ids are int32: unreachable in practice, but be explicit.
    assert n < (2**31 - 2 * MAX_BLOCK_ROWS) * LANE

    # Lane-dense (rows, 128) view; rows is a multiple of the sublane packing
    # of the widest-packed input dtype (8 for f32, 16 for bf16/f16).
    sub = 8 * max(_packing(yhat.dtype), _packing(y.dtype))
    pad_unit = sub * LANE
    if n % pad_unit == 0:
        yhat2d = yhat.reshape(-1, LANE)
        y2d = y.reshape(-1, LANE)
    else:
        pad = (-n) % pad_unit
        # y tail padded with a -1000 sentinel so padded positions stay masked.
        yhat2d = jnp.pad(yhat.reshape(-1), (0, pad)).reshape(-1, LANE)
        y2d = jnp.pad(y.reshape(-1), (0, pad),
                      constant_values=-1000.0).reshape(-1, LANE)
    rows = yhat2d.shape[0]

    block_rows = min(MAX_BLOCK_ROWS, rows)
    total_blocks = pl.cdiv(rows, block_rows)
    num_shards = _num_shards_for_device(total_blocks)
    blocks_per_shard = pl.cdiv(total_blocks, num_shards)
    group_rows = _pick_group_rows(block_rows, sub)
    needs_tail_mask = (rows % block_rows != 0) or (
        num_shards * blocks_per_shard > total_blocks)

    def in_index_map(s, i):
        blk = s * blocks_per_shard + i
        # Clamp so no DMA is ever issued for a fully out-of-range block; the
        # kernel's tail path discards re-read rows via the *unclamped*
        # logical position.
        return (jnp.minimum(blk, total_blocks - 1), 0)

    kernel = functools.partial(
        _mask_loss_kernel,
        rows_valid=rows,
        blocks_per_shard=blocks_per_shard,
        total_blocks=total_blocks,
        group_rows=group_rows,
        needs_tail_mask=needs_tail_mask,
    )

    loss_parts, cnt_parts = pl.pallas_call(
        kernel,
        out_shape=(
            jax.ShapeDtypeStruct((num_shards, 8, LANE), jnp.float32),
            jax.ShapeDtypeStruct((num_shards, 8, LANE), jnp.float32),
        ),
        grid_spec=pltpu.PrefetchScalarGridSpec(
            num_scalar_prefetch=0,
            grid=(num_shards, blocks_per_shard),
            in_specs=[
                pl.BlockSpec((block_rows, LANE), in_index_map),
                pl.BlockSpec((block_rows, LANE), in_index_map),
            ],
            out_specs=(
                pl.BlockSpec((1, 8, LANE), lambda s, i: (s, 0, 0)),
                pl.BlockSpec((1, 8, LANE), lambda s, i: (s, 0, 0)),
            ),
        ),
        # TODO(synk): on v7x verify in xprof that the "parallel" shard axis
        # actually lands on both TensorCores; if not, switch the outer axis to
        # pltpu.CORE_PARALLEL.
        compiler_params=pltpu.CompilerParams(
            dimension_semantics=("parallel", "arbitrary"),
        ),
    )(yhat2d, y2d)

    loss_sum = jnp.sum(loss_parts)
    cnt_sum = jnp.sum(cnt_parts)
    # "loss / num_non_zero if num_non_zero > 0 else 0.0" — scalar glue in JAX.
    return jnp.where(cnt_sum > 0, loss_sum / cnt_sum, jnp.float32(0.0))


def mask_loss_ref(yhat, y):
    """Pure-JAX reference for verification."""
    yhat = yhat.astype(jnp.float32)
    y = y.astype(jnp.float32)
    mask = (y > -999.0).astype(jnp.float32)
    diff = yhat - y
    absd = jnp.abs(diff)
    huber = jnp.where(absd < DELTA, 0.5 * diff * diff,
                      DELTA * (absd - 0.5 * DELTA))
    s = jnp.sum(huber * mask)
    c = jnp.sum(mask)
    return jnp.where(c > 0, s / c, jnp.float32(0.0))


if __name__ == "__main__":
    key = jax.random.PRNGKey(0)
    k1, k2, k3, k4, k5, k6, k7, k8, k9 = jax.random.split(key, 9)

    # 1) Small case consistent with a generic prediction/target pair.
    shape = (2, 4, 16, 16)
    yhat = jax.random.normal(k1, shape, dtype=jnp.float32) * 3.0
    y = jax.random.normal(k2, shape, dtype=jnp.float32) * 3.0
    y = jnp.where(jax.random.uniform(k3, shape) < 0.25,
                  jnp.float32(-1000.0), y)   # ~25% padding targets
    out = jax.block_until_ready(mask_loss(yhat, y))
    ref = mask_loss_ref(yhat, y)
    assert jnp.allclose(out, ref, rtol=1e-4, atol=1e-6), (out, ref)

    # 2) Multi-block case with a ragged final block (2056 rows, block 2048).
    shape2 = (2056, 128)
    yhat2 = jax.random.normal(k4, shape2, dtype=jnp.float32)
    y2 = jax.random.normal(k5, shape2, dtype=jnp.float32)
    y2 = jnp.where(jax.random.uniform(k6, shape2) < 0.5,
                   jnp.float32(-1000.0), y2)
    out2 = jax.block_until_ready(mask_loss(yhat2, y2))
    ref2 = mask_loss_ref(yhat2, y2)
    assert jnp.allclose(out2, ref2, rtol=1e-4, atol=1e-6), (out2, ref2)

    # 3) Fully masked case -> 0.0 (the "num_non_zero > 0" branch).
    y3 = jnp.full(shape, -1000.0, dtype=jnp.float32)
    out3 = jax.block_until_ready(mask_loss(yhat, y3))
    assert jnp.allclose(out3, 0.0), out3

    # 4) bf16 predictions + non-multiple-of-pad-unit size (exercises the
    #    dtype-aware pad path and the in-kernel cast).
    shape4 = (3, 5, 7)
    yhat4 = (jax.random.normal(k7, shape4, dtype=jnp.float32) * 2.0
             ).astype(jnp.bfloat16)
    y4 = jax.random.normal(k8, shape4, dtype=jnp.float32) * 2.0
    y4 = jnp.where(jax.random.uniform(k9, shape4) < 0.3,
                   jnp.float32(-1000.0), y4)
    out4 = jax.block_until_ready(mask_loss(yhat4, y4))
    ref4 = mask_loss_ref(yhat4, y4)
    assert jnp.allclose(out4, ref4, rtol=1e-4, atol=1e-6), (out4, ref4)

    print("KERNEL_OK")
</pallas_src>

<mosaic_0001>
module attributes {stable_mosaic.version = 11 : i64} {
  func.func @_mask_loss_kernel(%arg0: i32, %arg1: i32, %arg2: memref<16x128xf32, #tpu.memory_space<vmem>>, %arg3: memref<16x128xf32, #tpu.memory_space<vmem>>, %arg4: memref<1x8x128xf32, #tpu.memory_space<vmem>>, %arg5: memref<1x8x128xf32, #tpu.memory_space<vmem>>) attributes {dimension_semantics = [#tpu.dimension_semantics<parallel>, #tpu.dimension_semantics<arbitrary>], iteration_bounds = array<i64: 1, 1>, scalar_prefetch = 0 : i64, scratch_operands = 0 : i64, tpu.core_type = #tpu.core_type<tc>, window_params = [{transform_indices = @transform_0, window_bounds = array<i64: 16, 128>}, {transform_indices = @transform_1, window_bounds = array<i64: 16, 128>}, {transform_indices = @transform_2, window_bounds = array<i64: 1, 8, 128>}, {transform_indices = @transform_3, window_bounds = array<i64: 1, 8, 128>}]} {
    %c0_i32 = arith.constant 0 : i32
    %0 = arith.cmpi eq, %arg1, %c0_i32 : i32
    %1 = arith.extui %0 : i1 to i32
    %c0_i32_0 = arith.constant 0 : i32
    %2 = arith.cmpi ne, %1, %c0_i32_0 : i32
    scf.if %2 {
      %cst_20 = arith.constant 0.000000e+00 : f32
      %37 = vector.broadcast %cst_20 : f32 to vector<1x8x128xf32>
      %c0_21 = arith.constant 0 : index
      %c0_22 = arith.constant 0 : index
      %c0_23 = arith.constant 0 : index
      %38 = vector.load %arg4[%c0_21, %c0_22, %c0_23] : memref<1x8x128xf32, #tpu.memory_space<vmem>>, vector<1x8x128xf32>
      tpu.vector_store %arg4[%c0_21, %c0_22, %c0_23], %37 {strides = array<i32>} : memref<1x8x128xf32, #tpu.memory_space<vmem>>, vector<1x8x128xf32>,
      %cst_24 = arith.constant 0.000000e+00 : f32
      %39 = vector.broadcast %cst_24 : f32 to vector<1x8x128xf32>
      %c0_25 = arith.constant 0 : index
      %c0_26 = arith.constant 0 : index
      %c0_27 = arith.constant 0 : index
      %40 = vector.load %arg5[%c0_25, %c0_26, %c0_27] : memref<1x8x128xf32, #tpu.memory_space<vmem>>, vector<1x8x128xf32>
      tpu.vector_store %arg5[%c0_25, %c0_26, %c0_27], %39 {strides = array<i32>} : memref<1x8x128xf32, #tpu.memory_space<vmem>>, vector<1x8x128xf32>,
    } else {
    }
    %cst = arith.constant 0.000000e+00 : f32
    %3 = vector.broadcast %cst : f32 to vector<8x128xf32>
    %c0_i32_1 = arith.constant 0 : i32
    %c16_i32 = arith.constant 16 : i32
    %4 = arith.muli %c0_i32_1, %c16_i32 : i32
    %5 = tpu.assume_multiple %4, 16 : i32
    %6 = arith.index_cast %5 : i32 to index
    %c0 = arith.constant 0 : index
    %7 = vector.load %arg2[%6, %c0] : memref<16x128xf32, #tpu.memory_space<vmem>>, vector<16x128xf32>
    %8 = arith.index_cast %5 : i32 to index
    %c0_2 = arith.constant 0 : index
    %9 = vector.load %arg3[%8, %c0_2] : memref<16x128xf32, #tpu.memory_space<vmem>>, vector<16x128xf32>
    %10 = arith.subf %7, %9 : vector<16x128xf32>
    %11 = math.absf %10 : vector<16x128xf32>
    %cst_3 = arith.constant 2.000000e+00 : f32
    %12 = vector.broadcast %cst_3 : f32 to vector<16x128xf32>
    %13 = arith.minimumf %11, %12 : vector<16x128xf32>
    %cst_4 = arith.constant 5.000000e-01 : f32
    %14 = vector.broadcast %cst_4 : f32 to vector<16x128xf32>
    %15 = arith.mulf %14, %13 : vector<16x128xf32>
    %16 = arith.subf %11, %15 : vector<16x128xf32>
    %17 = arith.mulf %13, %16 : vector<16x128xf32>
    %cst_5 = arith.constant -9.990000e+02 : f32
    %18 = vector.broadcast %cst_5 : f32 to vector<16x128xf32>
    %19 = arith.cmpf ogt, %9, %18 : vector<16x128xf32>
    %20 = arith.extui %19 : vector<16x128xi1> to vector<16x128xi32>
    %21 = arith.sitofp %20 : vector<16x128xi32> to vector<16x128xf32>
    %22 = arith.mulf %17, %21 : vector<16x128xf32>
    %23 = vector.shape_cast %22 : vector<16x128xf32> to vector<2x8x128xf32>
    %cst_6 = arith.constant dense<0.000000e+00> : vector<8x128xf32>
    %24 = vector.multi_reduction <add>, %23, %cst_6 [0] : vector<2x8x128xf32> to vector<8x128xf32>
    %25 = arith.addf %3, %24 : vector<8x128xf32>
    %26 = vector.shape_cast %21 : vector<16x128xf32> to vector<2x8x128xf32>
    %cst_7 = arith.constant dense<0.000000e+00> : vector<8x128xf32>
    %27 = vector.multi_reduction <add>, %26, %cst_7 [0] : vector<2x8x128xf32> to vector<8x128xf32>
    %28 = arith.addf %3, %27 : vector<8x128xf32>
    %c1_i32 = arith.constant 1 : i32
    %c0_8 = arith.constant 0 : index
    %c0_9 = arith.constant 0 : index
    %c0_10 = arith.constant 0 : index
    %29 = vector.load %arg4[%c0_8, %c0_9, %c0_10] : memref<1x8x128xf32, #tpu.memory_space<vmem>>, vector<1x8x128xf32>
    %30 = vector.shape_cast %25 : vector<8x128xf32> to vector<1x8x128xf32>
    %31 = arith.addf %29, %30 : vector<1x8x128xf32>
    %c0_11 = arith.constant 0 : index
    %c0_12 = arith.constant 0 : index
    %c0_13 = arith.constant 0 : index
    %32 = vector.load %arg4[%c0_11, %c0_12, %c0_13] : memref<1x8x128xf32, #tpu.memory_space<vmem>>, vector<1x8x128xf32>
    tpu.vector_store %arg4[%c0_11, %c0_12, %c0_13], %31 {strides = array<i32>} : memref<1x8x128xf32, #tpu.memory_space<vmem>>, vector<1x8x128xf32>,
    %c0_14 = arith.constant 0 : index
    %c0_15 = arith.constant 0 : index
    %c0_16 = arith.constant 0 : index
    %33 = vector.load %arg5[%c0_14, %c0_15, %c0_16] : memref<1x8x128xf32, #tpu.memory_space<vmem>>, vector<1x8x128xf32>
    %34 = vector.shape_cast %28 : vector<8x128xf32> to vector<1x8x128xf32>
    %35 = arith.addf %33, %34 : vector<1x8x128xf32>
    %c0_17 = arith.constant 0 : index
    %c0_18 = arith.constant 0 : index
    %c0_19 = arith.constant 0 : index
    %36 = vector.load %arg5[%c0_17, %c0_18, %c0_19] : memref<1x8x128xf32, #tpu.memory_space<vmem>>, vector<1x8x128xf32>
    tpu.vector_store %arg5[%c0_17, %c0_18, %c0_19], %35 {strides = array<i32>} : memref<1x8x128xf32, #tpu.memory_space<vmem>>, vector<1x8x128xf32>,
    return
  }
  func.func @transform_0(%arg0: i32, %arg1: i32) -> (i32, i32) {
    %c1_i32 = arith.constant 1 : i32
    %0 = arith.muli %arg0, %c1_i32 : i32
    %1 = arith.addi %0, %arg1 : i32
    %c0_i32 = arith.constant 0 : i32
    %2 = arith.minsi %1, %c0_i32 : i32
    %c0_i32_0 = arith.constant 0 : i32
    %c0_i32_1 = arith.constant 0 : i32
    return %2, %c0_i32_0 : i32, i32
  }
  func.func @transform_1(%arg0: i32, %arg1: i32) -> (i32, i32) {
    %c1_i32 = arith.constant 1 : i32
    %0 = arith.muli %arg0, %c1_i32 : i32
    %1 = arith.addi %0, %arg1 : i32
    %c0_i32 = arith.constant 0 : i32
    %2 = arith.minsi %1, %c0_i32 : i32
    %c0_i32_0 = arith.constant 0 : i32
    %c0_i32_1 = arith.constant 0 : i32
    return %2, %c0_i32_0 : i32, i32
  }
  func.func @transform_2(%arg0: i32, %arg1: i32) -> (i32, i32, i32) {
    %c0_i32 = arith.constant 0 : i32
    %c0_i32_0 = arith.constant 0 : i32
    %c0_i32_1 = arith.constant 0 : i32
    return %arg0, %c0_i32, %c0_i32_0 : i32, i32, i32
  }
  func.func @transform_3(%arg0: i32, %arg1: i32) -> (i32, i32, i32) {
    %c0_i32 = arith.constant 0 : i32
    %c0_i32_0 = arith.constant 0 : i32
    %c0_i32_1 = arith.constant 0 : i32
    return %arg0, %c0_i32, %c0_i32_0 : i32, i32, i32
  }
}

</mosaic_0001>

<bundles_post_ra>
// kernel: tpu_custom_call.1
= control target key start
LH: loop header
LB: loop body
LE: loop exit
PB: predicated region body
PF: predicated region fallthrough
CT: control target
= control target key end

     0   :  { %9 = vsyncpa [#allocation3], 0  ;;  %s317_s0 = inlined_call_operand.hbm [shape: f32[16,128], index: 0, kind: input, shape index: {}]   ;;  %s318_s1 = inlined_call_operand.hbm [shape: f32[16,128], index: 1, kind: input, shape index: {}]   ;;  %s319_s2 = inlined_call_operand.hbm [shape: f32[1,8,128], index: 2, kind: output, shape index: {0}]   ;;  %s320_s3 = inlined_call_operand.hbm [shape: f32[1,8,128], index: 3, kind: output, shape index: {1}]  }
   0x1   :  { %10 = vsyncpa [#allocation6], 0 }
   0x2   :  { %11 = vsyncpa [#allocation4], 0 }
   0x3   :  { %12 = vsyncpa [#allocation9], 0  ;;  %s242_s12 = smov [#allocation2]   ;;  %s146_s16 = scalar_lea.hbm %s317_s0, 256 }
   0x4   :  { %s24_s13 = sshll.u32 %s242_s12, 4  ;;  %p147_p0 = scmp.ne.s32.totalorder %s317_s0, %s146_s16  ;;  %s25_s13 = int_to_ptr.vmem [resolvable:$true] %s24_s13 }
   0x5   :  { %p150_p1 = scmp.lt.u32.totalorder %s146_s16, %s317_s0 }
   0x7   :  { %p152_p2 = pnand %p150_p1, %p147_p0 }
   0x9   :  { %155 = shalt.err (!%p152_p2)
}
   0xa   :  { %s156_s21 = scalar_lea.vmem %s25_s13, 256  ;;  %p161_p4 = scmp.lt.s32.totalorder %s25_s13, %s25_s13 }
   0xb   :  { %p157_p3 = scmp.ne.s32.totalorder %s25_s13, %s156_s21  ;;  %p162_p5 = scmp.lt.s32.totalorder %s156_s21, %s156_s21 }
   0xd   :  { %p163_p6 = por %p162_p5, %p161_p4 }
   0xf   :  { %p164_p7 = pnand %p163_p6, %p157_p3 }
  0x11   :  { %167 = shalt.err (!%p164_p7)
}
  0x12   :  { %s243_s22 = smov 128   ;;  %s244_s23 = smov 8  }
  0x13   :  { %30 = dma.hbm_to_vmem [thread:$0]  %s317_s0, 256, %s25_s13, [#allocation3], %s243_s22, %s243_s22, %s244_s23  }
  0x14   :  { %s245_s26 = smov [#allocation5]   ;;  %s168_s30 = scalar_lea.hbm %s318_s1, 256 }
  0x15   :  { %s42_s27 = sshll.u32 %s245_s26, 4  ;;  %p169_p8 = scmp.ne.s32.totalorder %s318_s1, %s168_s30  ;;  %s43_s27 = int_to_ptr.vmem [resolvable:$true] %s42_s27 }
  0x16   :  { %p172_p9 = scmp.lt.u32.totalorder %s168_s30, %s318_s1 }
  0x18   :  { %p174_p10 = pnand %p172_p9, %p169_p8 }
  0x1a   :  { %177 = shalt.err (!%p174_p10)
}
  0x1b   :  { %s178_s8 = scalar_lea.vmem %s43_s27, 256  ;;  %p183_p12 = scmp.lt.s32.totalorder %s43_s27, %s43_s27 }
  0x1c   :  { %p179_p11 = scmp.ne.s32.totalorder %s43_s27, %s178_s8  ;;  %p184_p13 = scmp.lt.s32.totalorder %s178_s8, %s178_s8 }
  0x1e   :  { %p185_p0 = por %p184_p13, %p183_p12 }
  0x20   :  { %p186_p1 = pnand %p185_p0, %p179_p11 }
  0x22   :  { %189 = shalt.err (!%p186_p1)
}
  0x23   :  { %48 = dma.hbm_to_vmem [thread:$0]  %s318_s1, 256, %s43_s27, [#allocation6], %s243_s22, %s243_s22, %s244_s23  }
  0x24   :  { %234 = dma.done.wait [#allocation3], 256  }
  0x25   :  { %235 = vsyncadd [#allocation3], 4294967040 }
  0x26   :  { %236 = dma.done.wait [#allocation6], 256  }
  0x27   :  { %237 = vsyncadd [#allocation6], 4294967040  ;;  %v69_v0 = vld [vmem:[#allocation2] sm:$0xff]  ;;  %v70_v1 = vld [vmem:[#allocation2 + $0x8] sm:$0xff]  ;;  %v246_v7 = vmov 0.0   ;;  %s247_s10 = smov [#allocation8]  }
  0x28   :  { %v71_v2 = vld [vmem:[#allocation5] sm:$0xff]  ;;  %v72_v3 = vld [vmem:[#allocation5 + $0x8] sm:$0xff]  ;;  %s119_s11 = sshll.u32 %s247_s10, 4  ;;  %s120_s11 = int_to_ptr.vmem [resolvable:$true] %s119_s11 }
  0x29   :  { %v73_v4 = vsub.f32 %v69_v0, %v71_v2  ;;  %vm85_vm0 = vcmp.gt.f32.partialorder %v71_v2, -999.0  ;;  %v74_v5 = vsub.f32 %v70_v1, %v72_v3  ;;  %vm86_vm1 = vcmp.gt.f32.partialorder %v72_v3, -999.0  ;;  %s190_s1 = scalar_lea.vmem %s120_s11, 128  ;;  %p195_p3 = scmp.lt.s32.totalorder %s120_s11, %s120_s11 }
  0x2a   :  { %v137_v8 = vsel %vm85_vm0, 1.0, %v246_v7  ;;  %v138_v9 = vsel %vm86_vm1, 1.0, %v246_v7  ;;  %p191_p2 = scmp.ne.s32.totalorder %s120_s11, %s190_s1  ;;  %p196_p4 = scmp.lt.s32.totalorder %s190_s1, %s190_s1 }
  0x2b   :  { %v75_v6 = vand.u32 2147483647, %v73_v4  ;;  %v76_v10 = vand.u32 2147483647, %v74_v5  ;;  %v95_v11 = vadd.f32 %v138_v9, %v137_v8 }
  0x2c   :  { %p197_p5 = por %p196_p4, %p195_p3 }
  0x2d   :  { %v77_v12 = vmin.f32 %v75_v6, 2.0  ;;  %v78_v13 = vmin.f32 %v76_v10, 2.0  ;;  %102 = vst [vmem:[#allocation8] sm:$0xff] %v95_v11 }
  0x2e   :  { %p198_p6 = pnand %p197_p5, %p191_p2 }
  0x2f   :  { %v79_v14 = vmul.f32 0.5, %v77_v12  ;;  %v80_v15 = vmul.f32 0.5, %v78_v13 }
  0x31   :  { %v81_v16 = vsub.f32 %v75_v6, %v79_v14 }
  0x32   :  { %201 = shalt.err (!%p198_p6)
}
  0x33   :  { %s202_s14 = scalar_lea.hbm %s320_s3, 128 }
  0x34   :  { %p203_p7 = scmp.ne.s32.totalorder %s320_s3, %s202_s14  ;;  %p206_p8 = scmp.lt.u32.totalorder %s202_s14, %s320_s3 }
  0x36   :  { %p208_p9 = pnand %p206_p8, %p203_p7 }
  0x38   :  { %211 = shalt.err (!%p208_p9)
}
  0x39   :  { %122 = dma.vmem_to_hbm [thread:$0]  %s120_s11, 128, %s320_s3, [#allocation9]   ;;  %v82_v17 = vsub.f32 %v76_v10, %v80_v15  ;;  %v83_v18 = vmul.f32 %v81_v16, %v77_v12 }
  0x3a   :  { %s248_s21 = smov [#allocation7]  }
  0x3b   :  { %v84_v19 = vmul.f32 %v82_v17, %v78_v13  ;;  %v91_v20 = vmul.f32 %v137_v8, %v83_v18  ;;  %s109_s22 = sshll.u32 %s248_s21, 4  ;;  %s110_s22 = int_to_ptr.vmem [resolvable:$true] %s109_s22 }
  0x3c   :  { %s212_s23 = scalar_lea.vmem %s110_s22, 128  ;;  %p217_p11 = scmp.lt.s32.totalorder %s110_s22, %s110_s22 }
  0x3d   :  { %v92_v21 = vmul.f32 %v138_v9, %v84_v19  ;;  %p213_p10 = scmp.ne.s32.totalorder %s110_s22, %s212_s23  ;;  %p218_p12 = scmp.lt.s32.totalorder %s212_s23, %s212_s23 }
  0x3f   :  { %v93_v22 = vadd.f32 %v92_v21, %v91_v20  ;;  %p219_p13 = por %p218_p12, %p217_p11 }
  0x41   :  { %99 = vst [vmem:[#allocation7] sm:$0xff] %v93_v22  ;;  %p220_p0 = pnand %p219_p13, %p213_p10 }
  0x43   :  { %223 = shalt.err (!%p220_p0)
}
  0x44   :  { %s224_s3 = scalar_lea.hbm %s319_s2, 128 }
  0x45   :  { %p225_p1 = scmp.ne.s32.totalorder %s319_s2, %s224_s3  ;;  %p228_p2 = scmp.lt.u32.totalorder %s224_s3, %s319_s2 }
  0x47   :  { %p230_p3 = pnand %p228_p2, %p225_p1 }
  0x49   :  { %233 = shalt.err (!%p230_p3)
}
  0x4a   :  { %112 = dma.vmem_to_hbm [thread:$0]  %s110_s22, 128, %s319_s2, [#allocation4]  }
  0x4b   :  { %238 = dma.done.wait [#allocation4], 128  }
  0x4c   :  { %239 = vsyncadd [#allocation4], 4294967168 }
  0x4d   :  { %240 = dma.done.wait [#allocation9], 128  }
  0x4e   :  { %241 = vsyncadd [#allocation9], 4294967168 }
  0x4f   :  { %129 = vsyncpa [#allocation3], 1 }
  0x50   :  { %130 = vsyncpa [#allocation6], 1 }
  0x51   :  { %131 = vsyncpa [#allocation4], 1 }
  0x52   :  { %132 = vsyncpa [#allocation9], 1 }

</bundles_post_ra>
